<compile_context>
chip_gen: v6e
topology: v6e:2x2x1
jax: 0.10.0
libtpu: 0.0.40
codegen_flags: <defaults>
</compile_context>

<pallas_src>
import jax
import jax.numpy as jnp
from jax.experimental import pallas as pl
from jax.experimental.pallas import tpu as pltpu

EPS = 1e-5  # clamp used by the repo's log_bernoulli helper (dead code here)


def decoder_logprob_kernel(z_ref, x_ref, w1_ref, b1_ref, w2_ref, b2_ref, out_ref):
    # One batch tile per grid step; weights/biases are VMEM-resident (constant maps).
    z = z_ref[...]                                                     # [TM, L] bf16
    x = x_ref[...]                                                     # [TM, O] int8/bool

    # latent -> hidden: MXU bf16 x bf16, f32 accumulation; bias + ReLU in f32.
    h1 = jnp.dot(z, w1_ref[...], preferred_element_type=jnp.float32)  # [TM, H]
    h1 = jnp.maximum(h1 + b1_ref[...], 0.0)

    # hidden -> output logits.
    logits = jnp.dot(h1.astype(jnp.bfloat16), w2_ref[...],
                     preferred_element_type=jnp.float32)               # [TM, O]
    logits = logits + b2_ref[...]

    # r = sigmoid(logits) via one tanh (1 EUP op vs exp + divide).
    r = 0.5 * jnp.tanh(0.5 * logits) + 0.5

    # Exact stable identity (r in (0,1), EPS clip never fires):
    #   x*log(sigmoid(r)) + (1-x)*log(1-sigmoid(r)) = x*r - log(1+exp(r))
    if jnp.issubdtype(x.dtype, jnp.floating):
        xr = x.astype(jnp.float32) * r
    else:
        xr = jnp.where(x != 0, r, 0.0)          # bit-identical to x*r for 0/1 targets
    log_p = xr - jnp.log(1.0 + jnp.exp(r))                              # [TM, O]

    # Lane-dense store: per-row sums as a (1, TM) row instead of a (TM, 1) column.
    out_ref[...] = jnp.sum(log_p, axis=-1)[None, :]


def _round_up(n, m):
    return (n + m - 1) // m * m


def decoder_log_prob(z, x, w1, b1, w2, b2, *, block_rows=2048):
    """z: [B, L]; x: [B, O] binary targets (pass int8/bool — dominant HBM stream);
    w*: [in, out] (transposed vs nn.Linear); b*: [out] or [1, out].

    Returns log_p: [B] float32 (sum over the last feature dim per row).
    """
    B, L = z.shape
    H = w1.shape[1]
    O = w2.shape[1]
    assert x.shape == (B, O)
    assert block_rows % 128 == 0, "block_rows must be a multiple of 128"

    # Narrow dtypes at the call boundary (saves DMA bytes; MXU is nowhere near
    # the roofline here, so bf16 buys nothing in compute — only bandwidth).
    z = z.astype(jnp.bfloat16)
    w1 = w1.astype(jnp.bfloat16)
    w2 = w2.astype(jnp.bfloat16)
    b1 = b1.astype(jnp.float32).reshape(1, H)
    b2 = b2.astype(jnp.float32).reshape(1, O)
    # x is left untouched: callers should already supply int8/bool/bf16.

    # Batch tile: large enough to amortize the ~0.35us/step overhead, but >=2
    # grid steps for B > 128 so v7x's two TensorCores can split the parallel axis.
    if B <= 128:
        tm = 128
    else:
        tm = min(block_rows, _round_up(pl.cdiv(B, 2), 128))
    n_blk = pl.cdiv(B, tm)   # ragged last tile handled by Pallas; no host-side pad

    bytes_accessed = (z.size * z.dtype.itemsize + x.size * x.dtype.itemsize
                      + w1.size * 2 + w2.size * 2 + (H + O) * 4 + B * 4)
    cost = pl.CostEstimate(
        flops=2 * B * (L * H + H * O) + 8 * B * O,
        transcendentals=3 * B * O,            # tanh, exp, log per element
        bytes_accessed=int(bytes_accessed),
    )

    out = pl.pallas_call(
        decoder_logprob_kernel,
        out_shape=jax.ShapeDtypeStruct((1, B), jnp.float32),
        grid=(n_blk,),
        in_specs=[
            pl.BlockSpec((tm, L), lambda i: (i, 0)),   # z: batch-tiled, bf16
            pl.BlockSpec((tm, O), lambda i: (i, 0)),   # x: batch-tiled, int8
            pl.BlockSpec((L, H), lambda i: (0, 0)),    # w1: VMEM-resident
            pl.BlockSpec((1, H), lambda i: (0, 0)),    # b1: VMEM-resident
            pl.BlockSpec((H, O), lambda i: (0, 0)),    # w2: VMEM-resident
            pl.BlockSpec((1, O), lambda i: (0, 0)),    # b2: VMEM-resident
        ],
        out_specs=pl.BlockSpec((1, tm), lambda i: (0, i)),  # lane-dense row of sums
        compiler_params=pltpu.CompilerParams(
            dimension_semantics=("parallel",)),
        cost_estimate=cost,
    )(z, x, w1, b1, w2, b2)
    return out[0]


def _reference_log_prob(z, x, w1, b1, w2, b2):
    # Faithful f32 reference (original formulation: double sigmoid + clip + logs).
    h1 = jax.nn.relu(z @ w1 + b1)
    mu_d = jax.nn.sigmoid(jax.nn.sigmoid(h1 @ w2 + b2))
    pp = jnp.clip(mu_d, EPS, 1.0 - EPS)
    return jnp.sum(x * jnp.log(pp) + (1.0 - x) * jnp.log(1.0 - pp), axis=-1)


if __name__ == "__main__":
    # Small but non-trivial shapes: batch is not a multiple of the 128-row tile,
    # so the no-pad ragged-tail path and the 2-step batch-tiled grid are exercised.
    B = 200
    n_latent = 16
    n_hidden = 32
    n_output = 128

    key = jax.random.PRNGKey(0)
    k_z, k_x, k_w1, k_b1, k_w2, k_b2 = jax.random.split(key, 6)

    # Deterministic PyTorch-Linear-style init U(-1/sqrt(fan_in), 1/sqrt(fan_in)),
    # stored as [in, out].
    bnd1 = 1.0 / float(jnp.sqrt(n_latent))
    bnd2 = 1.0 / float(jnp.sqrt(n_hidden))
    w1 = jax.random.uniform(k_w1, (n_latent, n_hidden), jnp.float32, -bnd1, bnd1)
    b1 = jax.random.uniform(k_b1, (1, n_hidden), jnp.float32, -bnd1, bnd1)
    w2 = jax.random.uniform(k_w2, (n_hidden, n_output), jnp.float32, -bnd2, bnd2)
    b2 = jax.random.uniform(k_b2, (1, n_output), jnp.float32, -bnd2, bnd2)

    z = jax.random.normal(k_z, (B, n_latent), jnp.float32)
    # Binary targets passed as int8 (4x fewer HBM bytes than f32 on the dominant stream).
    x_bits = (jax.random.uniform(k_x, (B, n_output)) < 0.5).astype(jnp.int8)

    log_p = decoder_log_prob(z, x_bits, w1, b1, w2, b2, block_rows=2048)
    log_p = jax.block_until_ready(log_p)

    ref = _reference_log_prob(z, x_bits.astype(jnp.float32), w1, b1, w2, b2)
    assert log_p.shape == (B,)
    # bf16 MXU operands vs f32 reference (accumulation stays f32) -> loose-ish tol.
    max_err = float(jnp.max(jnp.abs(log_p - ref)))
    assert jnp.allclose(log_p, ref, atol=2e-1, rtol=5e-3), max_err

    # TODO(synk): the type='decoder' branch (torch.bernoulli sampling) is stochastic
    # host-side sugar and is intentionally not implemented in the kernel.
    print("KERNEL_OK")
</pallas_src>

<mosaic_0001>
module attributes {stable_mosaic.version = 11 : i64} {
  func.func @decoder_logprob_kernel(%arg0: i32, %arg1: memref<128x16xbf16, #tpu.memory_space<vmem>>, %arg2: memref<128x128xi8, #tpu.memory_space<vmem>>, %arg3: memref<16x32xbf16, #tpu.memory_space<vmem>>, %arg4: memref<1x32xf32, #tpu.memory_space<vmem>>, %arg5: memref<32x128xbf16, #tpu.memory_space<vmem>>, %arg6: memref<1x128xf32, #tpu.memory_space<vmem>>, %arg7: memref<1x128xf32, #tpu.memory_space<vmem>>) attributes {dimension_semantics = [#tpu.dimension_semantics<parallel>], iteration_bounds = array<i64: 2>, scalar_prefetch = 0 : i64, scratch_operands = 0 : i64, tpu.core_type = #tpu.core_type<tc>, window_params = [{transform_indices = @transform_0, window_bounds = array<i64: 128, 16>}, {transform_indices = @transform_1, window_bounds = array<i64: 128, 128>}, {pipeline_mode = #tpu.pipeline_mode<synchronous>, transform_indices = @transform_2, window_bounds = array<i64: 16, 32>}, {pipeline_mode = #tpu.pipeline_mode<synchronous>, transform_indices = @transform_3, window_bounds = array<i64: 1, 32>}, {pipeline_mode = #tpu.pipeline_mode<synchronous>, transform_indices = @transform_4, window_bounds = array<i64: 32, 128>}, {pipeline_mode = #tpu.pipeline_mode<synchronous>, transform_indices = @transform_5, window_bounds = array<i64: 1, 128>}, {transform_indices = @transform_6, window_bounds = array<i64: 1, 128>}]} {
    %c0 = arith.constant 0 : index
    %c0_0 = arith.constant 0 : index
    %0 = vector.load %arg1[%c0, %c0_0] : memref<128x16xbf16, #tpu.memory_space<vmem>>, vector<128x16xbf16>
    %c0_1 = arith.constant 0 : index
    %c0_2 = arith.constant 0 : index
    %1 = vector.load %arg2[%c0_1, %c0_2] : memref<128x128xi8, #tpu.memory_space<vmem>>, vector<128x128xi8>
    %c0_3 = arith.constant 0 : index
    %c0_4 = arith.constant 0 : index
    %2 = vector.load %arg3[%c0_3, %c0_4] : memref<16x32xbf16, #tpu.memory_space<vmem>>, vector<16x32xbf16>
    %cst = arith.constant dense<0.000000e+00> : vector<128x32xf32>
    %3 = tpu.matmul %0, %2, %cst {dimension_numbers = #tpu.dot_dimension_numbers<[1], [0], [0], [1], [0, 0, 1, 1], [], []>} : vector<128x16xbf16>, vector<16x32xbf16>, vector<128x32xf32> -> vector<128x32xf32>
    %c0_5 = arith.constant 0 : index
    %c0_6 = arith.constant 0 : index
    %4 = vector.load %arg4[%c0_5, %c0_6] : memref<1x32xf32, #tpu.memory_space<vmem>>, vector<1x32xf32>
    %5 = vector.broadcast %4 : vector<1x32xf32> to vector<128x32xf32>
    %6 = arith.addf %3, %5 : vector<128x32xf32>
    %cst_7 = arith.constant 0.000000e+00 : f32
    %7 = vector.broadcast %cst_7 : f32 to vector<128x32xf32>
    %8 = arith.maximumf %6, %7 : vector<128x32xf32>
    %9 = arith.truncf %8 : vector<128x32xf32> to vector<128x32xbf16>
    %c0_8 = arith.constant 0 : index
    %c0_9 = arith.constant 0 : index
    %10 = vector.load %arg5[%c0_8, %c0_9] : memref<32x128xbf16, #tpu.memory_space<vmem>>, vector<32x128xbf16>
    %cst_10 = arith.constant dense<0.000000e+00> : vector<128x128xf32>
    %11 = tpu.matmul %9, %10, %cst_10 {dimension_numbers = #tpu.dot_dimension_numbers<[1], [0], [0], [1], [0, 0, 1, 1], [], []>} : vector<128x32xbf16>, vector<32x128xbf16>, vector<128x128xf32> -> vector<128x128xf32>
    %c0_11 = arith.constant 0 : index
    %c0_12 = arith.constant 0 : index
    %12 = vector.load %arg6[%c0_11, %c0_12] : memref<1x128xf32, #tpu.memory_space<vmem>>, vector<1x128xf32>
    %13 = vector.broadcast %12 : vector<1x128xf32> to vector<128x128xf32>
    %14 = arith.addf %11, %13 : vector<128x128xf32>
    %cst_13 = arith.constant 5.000000e-01 : f32
    %15 = vector.broadcast %cst_13 : f32 to vector<128x128xf32>
    %16 = arith.mulf %15, %14 : vector<128x128xf32>
    %17 = math.tanh %16 : vector<128x128xf32>
    %cst_14 = arith.constant 5.000000e-01 : f32
    %18 = vector.broadcast %cst_14 : f32 to vector<128x128xf32>
    %19 = arith.mulf %18, %17 : vector<128x128xf32>
    %cst_15 = arith.constant 5.000000e-01 : f32
    %20 = vector.broadcast %cst_15 : f32 to vector<128x128xf32>
    %21 = arith.addf %19, %20 : vector<128x128xf32>
    %c0_i8 = arith.constant 0 : i8
    %22 = vector.broadcast %c0_i8 : i8 to vector<128x128xi8>
    %23 = arith.cmpi ne, %1, %22 : vector<128x128xi8>
    %cst_16 = arith.constant 0.000000e+00 : f32
    %24 = vector.broadcast %cst_16 : f32 to vector<128x128xf32>
    %25 = arith.select %23, %21, %24 : vector<128x128xi1>, vector<128x128xf32>
    %26 = math.exp %21 : vector<128x128xf32>
    %cst_17 = arith.constant 1.000000e+00 : f32
    %27 = vector.broadcast %cst_17 : f32 to vector<128x128xf32>
    %28 = arith.addf %27, %26 : vector<128x128xf32>
    %29 = math.log %28 : vector<128x128xf32>
    %30 = arith.subf %25, %29 : vector<128x128xf32>
    %cst_18 = arith.constant dense<0.000000e+00> : vector<128xf32>
    %31 = vector.multi_reduction <add>, %30, %cst_18 [1] : vector<128x128xf32> to vector<128xf32>
    %32 = vector.shape_cast %31 : vector<128xf32> to vector<1x128xf32>
    %c0_19 = arith.constant 0 : index
    %c0_20 = arith.constant 0 : index
    %33 = vector.load %arg7[%c0_19, %c0_20] : memref<1x128xf32, #tpu.memory_space<vmem>>, vector<1x128xf32>
    tpu.vector_store %arg7[%c0_19, %c0_20], %32 {strides = array<i32>} : memref<1x128xf32, #tpu.memory_space<vmem>>, vector<1x128xf32>,
    return
  }
  func.func @transform_0(%arg0: i32) -> (i32, i32) {
    %c0_i32 = arith.constant 0 : i32
    %c0_i32_0 = arith.constant 0 : i32
    return %arg0, %c0_i32 : i32, i32
  }
  func.func @transform_1(%arg0: i32) -> (i32, i32) {
    %c0_i32 = arith.constant 0 : i32
    %c0_i32_0 = arith.constant 0 : i32
    return %arg0, %c0_i32 : i32, i32
  }
  func.func @transform_2(%arg0: i32) -> (i32, i32) {
    %c0_i32 = arith.constant 0 : i32
    %c0_i32_0 = arith.constant 0 : i32
    %c0_i32_1 = arith.constant 0 : i32
    return %c0_i32, %c0_i32_0 : i32, i32
  }
  func.func @transform_3(%arg0: i32) -> (i32, i32) {
    %c0_i32 = arith.constant 0 : i32
    %c0_i32_0 = arith.constant 0 : i32
    %c0_i32_1 = arith.constant 0 : i32
    return %c0_i32, %c0_i32_0 : i32, i32
  }
  func.func @transform_4(%arg0: i32) -> (i32, i32) {
    %c0_i32 = arith.constant 0 : i32
    %c0_i32_0 = arith.constant 0 : i32
    %c0_i32_1 = arith.constant 0 : i32
    return %c0_i32, %c0_i32_0 : i32, i32
  }
  func.func @transform_5(%arg0: i32) -> (i32, i32) {
    %c0_i32 = arith.constant 0 : i32
    %c0_i32_0 = arith.constant 0 : i32
    %c0_i32_1 = arith.constant 0 : i32
    return %c0_i32, %c0_i32_0 : i32, i32
  }
  func.func @transform_6(%arg0: i32) -> (i32, i32) {
    %c0_i32 = arith.constant 0 : i32
    %c0_i32_0 = arith.constant 0 : i32
    return %c0_i32, %arg0 : i32, i32
  }
}

</mosaic_0001>

<bundles_post_ra>
// kernel: tpu_custom_call.1
= control target key start
LH: loop header
LB: loop body
LE: loop exit
PB: predicated region body
PF: predicated region fallthrough
CT: control target
= control target key end

     0   :  { %11 = vsyncpa [#allocation3], 0  ;;  %s1877_s0 = inlined_call_operand.vmem [shape: bf16[200,16], index: 0, kind: input, shape index: {}]   ;;  %s1878_s1 = inlined_call_operand.vmem [shape: s8[200,128], index: 1, kind: input, shape index: {}]   ;;  %s1879_s2 = inlined_call_operand.vmem [shape: bf16[16,32], index: 2, kind: input, shape index: {}]   ;;  %s1880_s3 = inlined_call_operand.vmem [shape: f32[1,32], index: 3, kind: input, shape index: {}]   ;;  %s1881_s4 = inlined_call_operand.vmem [shape: bf16[32,128], index: 4, kind: input, shape index: {}]   ;;  %s1882_s5 = inlined_call_operand.vmem [shape: f32[1,128], index: 5, kind: input, shape index: {}]   ;;  %s1883_s6 = inlined_call_operand.hbm [shape: f32[1,200], index: 6, kind: output, shape index: {}]  }
   0x1   :  { %13 = vsyncpa [#allocation3 + $0x1], 0  ;;  %s1518_s21 = smov 0   ;;  %s1520_s22 = smov 0  }
   0x2   :  { %s1522_s23 = smov 0   ;;  %s1524_s24 = smov 0  }
   0x3 LB: > { %s1174_s25 = sadd.s32 4294967295, %s1479_s24   ;;  %s1175_s26 = sadd.s32 4294967294, %s1479_s24   ;;  %s1479_s24 = sphi %s1524_s24, %s1909_s24   ;;  %s1475_s23 = sphi %s1522_s23, %s1908_s23   ;;  %s1471_s22 = sphi %s1520_s22, %s1907_s22   ;;  %s1467_s21 = sphi %s1518_s21, %s1906_s21  }
   0x4   : > { %s1541_s27 = sadd.s32 1, %s1479_s24   ;;  %s162_s28 = sadd.s32 1, %s1475_s23 }
   0x5   : > { %s159_s29 = ssub.s32 %s1479_s24, %s1541_s27  ;;  %p172_p0 = scmp.ne.s32.totalorder %s1475_s23, %s1471_s22 }
   0x6   : > { %p160_p1 = scmp.eq.s32.totalorder %s159_s29, 0  ;;  %p173_p2 = scmp.eq.s32.totalorder %s1174_s25, 1 }
   0x7   : > { %p178_p3 = scmp.ne.s32.totalorder %s1471_s22, %s1467_s21  ;;  %p179_p4 = scmp.eq.s32.totalorder %s1175_s26, 1 }
   0x8   : > { %s1551_s30 = scalar_select %p160_p1, %s1475_s23, %s162_s28  }
   0x9   : > { %p1553_p5 = por %p173_p2, %p172_p0  ;;  %p1557_p6 = por %p179_p4, %p178_p3 }
   0xa   : > { %p1178_p7 = scmp.ge.s32.totalorder %s1479_s24, 1  ;;  %p243_p8 = scmp.lt.s32.totalorder %s1479_s24, 3 }
   0xc   : > { %p244_p9 = pnand %p1178_p7, %p243_p8 }
   0xd   : > { %s1566_s11 = sshll.u32 (!%p244_p9), %s1174_s25, 4  ;;  %s1482_s26 = smov (!%p244_p9), [#allocation2]  }
   0xe   : > { %247 = sbr.rel (%p244_p9) target bundleno = 671 (0x29f), region = 44  ;;  %p290_p10 = scmp.lt.s32.totalorder (!%p244_p9), %s1566_s11, 24 }
   0xf   : > { %s1842_s19 = scalar_lea.hbm (!%p244_p9), %s1883_s6, %s1566_s11  ;;  %s1423_s28 = sshll.u32 (!%p244_p9), %s1482_s26, 4  ;;  %s1424_s28 = int_to_ptr.vmem [resolvable:$false] %s1423_s28 }
  0x10   : > { %s1425_s29 = scalar_lea.vmem (!%p244_p9), %s1424_s28, 32 }
  0x13   : > { %v1312_v0 = vld [vmem:[%s1879_s2] sm:$0xff]   ;;  %s1570_s12 = scalar_select %p290_p10, %s1566_s11, 24  ;;  %vm403_vm0 = vcmask 130048   ;;  %v1321_v9 = vld [vmem:[%s1881_s4 + $0x8] sm:$0xff]   ;;  %vm572_vm1 = vcmask 261120  }
  0x14   : > { %1234 = vmatprep.subr.bf16.mxu0 %v1312_v0  ;;  %1252 = vmatprep.subr.bf16.mxu1 %v1321_v9  ;;  %v1322_v10 = vld [vmem:[%s1881_s4] sm:$0xff]  }
  0x15   : > { %1235 = vmatpush3.bf16.msra.mxu0 %v1312_v0  ;;  %s1180_s13 = sshll.u32 %s1570_s12, 2  ;;  %1253 = vmatpush3.bf16.msra.mxu1 %v1321_v9  ;;  %v1183_v13 = vld [vmem:[%s1880_s3] ss:$0 sm:$0xff]  ;;  %s1182_s9 = sshll.u32 %s1570_s12, 1 }
  0x16   : > { %s293_s16 = scalar_lea.vmem %s1877_s0, %s1180_s13  ;;  %1254 = vmatprep.subr.bf16.mxu1 %v1322_v10  ;;  %s1640_s14 = scalar_lea.vmem %s1878_s1, %s1182_s9 }
  0x17   : > { %v1313_v1 = vld [vmem:[%s293_s16] sm:$0xff]   ;;  %v1314_v2 = vld [vmem:[%s293_s16 + $0x8] sm:$0xff]   ;;  %v1315_v3 = vld [vmem:[%s293_s16 + $0x10] sm:$0xff]   ;;  %s283_s12 = sand.u32 1, %s1471_s22  }
  0x18   : > { %1236 = vmatprep.mubr.msk.bf16.mxu0 %vm403_vm0, %v1313_v1  ;;  %v1316_v4 = vld [vmem:[%s293_s16 + $0x18] sm:$0xff]   ;;  %v1317_v5 = vld [vmem:[%s293_s16 + $0x20] sm:$0xff]   ;;  %v1318_v6 = vld [vmem:[%s293_s16 + $0x28] sm:$0xff]   ;;  %s284_s15 = scalar_lea.vmem [#allocation2], %s283_s12  ;;  %s1096_s20 = scalar_lea.sflag [#allocation3], %s283_s12 }
  0x19   : > { %1237 = vmatmul.mubr.msk.bf16.vlgmr.msra.gmra.mxu0 %vm403_vm0, %v1314_v2  ;;  %v1319_v7 = vld [vmem:[%s293_s16 + $0x30] sm:$0xff]   ;;  %v1320_v8 = vld [vmem:[%s293_s16 + $0x38] sm:$0xff]   ;;  %1255 = vmatpush3.bf16.msra.mxu1 %v1322_v10  ;;  %s1108_s16 = sshll.u32 %s284_s15, 4  ;;  %s1109_s16 = int_to_ptr.vmem [resolvable:$true] %s1108_s16 }
  0x1a   : > { %1240 = vmatprep.mubr.msk.bf16.mxu0 %vm403_vm0, %v1315_v3  ;;  %s1419_s25 = scalar_lea.vmem %s1109_s16, 16  ;;  %p1426_p0 = scmp.lt.s32.totalorder %s1109_s16, %s1424_s28 }
  0x1b   : > { %p1420_p11 = scmp.ne.s32.totalorder %s1109_s16, %s1419_s25  ;;  %p1427_p1 = scmp.lt.s32.totalorder %s1425_s29, %s1419_s25 }
  0x1d   : > { %p1421_p12 = pnand %p1420_p11, %p1553_p5  ;;  %p1428_p2 = por %p1427_p1, %p1426_p0 }
  0x1f   : > { %p1422_p13 = pneg %p1421_p12 }
  0x21   : > { %1241 = vmatmul.mubr.msk.bf16.gmra.mxu0 %vm403_vm0, %v1316_v4  ;;  %v1604_v4 = vld [vmem:[%s1882_s5] ss:$0 sm:$0xff]  ;;  %p1429_p3 = pnand %p1428_p2, %p1422_p13 }
  0x22   : > { %1244 = vmatprep.mubr.msk.bf16.mxu0 %vm403_vm0, %v1317_v5 }
  0x29   : > { %1245 = vmatmul.mubr.msk.bf16.gmra.mxu0 %vm403_vm0, %v1318_v6 }
  0x2a   : > { %1248 = vmatprep.mubr.msk.bf16.mxu0 %vm403_vm0, %v1319_v7 }
  0x31   : > { %1249 = vmatmul.mubr.msk.bf16.gmra.mxu0 %vm403_vm0, %v1320_v8 }
  0xd9   : > { %v1238_v11 = vpop.f32.mrf.mxu0 }
  0xda   : > { %v471_v17 = vadd.f32 %v1238_v11, %v1183_v13 }
  0xdb   : > { %v462_v12 = vpop.f32.mrf.mxu0 }
  0xdc   : > { %v463_v15 = vadd.f32 %v1183_v13, %v462_v12  ;;  %v527_v24 = vmax.f32 %v471_v17, 0.0 }
  0xdd   : > { %v1239_v14 = vpop.f32.mrf.mxu0 }
  0xde   : > { %v474_v16 = vadd.f32 %v1239_v14, %v1183_v13  ;;  %v525_v22 = vmax.f32 %v463_v15, 0.0 }
  0xdf   : > { %v465_v18 = vpop.f32.mrf.mxu0 }
  0xe0   : > { %v466_v19 = vadd.f32 %v1183_v13, %v465_v18  ;;  %v528_v20 = vmax.f32 %v474_v16, 0.0 }
  0xe1   : > { %v1242_v21 = vpop.f32.mrf.mxu0 }
  0xe2   : > { %v526_v23 = vmax.f32 %v466_v19, 0.0  ;;  %v542_v27 = vpack.c.bf16 %v528_v20, %v527_v24  ;;  %v487_v31 = vadd.f32 %v1242_v21, %v1183_v13 }
  0xe3   : > { %v478_v25 = vpop.f32.mrf.mxu0 }
  0xe4   : > { %v541_v26 = vpack.c.bf16 %v526_v23, %v525_v22  ;;  %v479_v29 = vadd.f32 %v1183_v13, %v478_v25  ;;  %v531_v38 = vmax.f32 %v487_v31, 0.0 }
  0xe5   : > { %v1243_v28 = vpop.f32.mrf.mxu0 }
  0xe6   : > { %v490_v30 = vadd.f32 %v1243_v28, %v1183_v13  ;;  %1256 = vmatprep.mubr.msk.bf16.mxu1 %vm572_vm1, %v541_v26  ;;  %v529_v36 = vmax.f32 %v479_v29, 0.0 }
  0xe7   : > { %v481_v32 = vpop.f32.mrf.mxu0  ;;  %1257 = vmatmul.mubr.msk.bf16.vlgmr.msra.gmra.mxu1 %vm572_vm1, %v542_v27 }
  0xe8   : > { %v482_v33 = vadd.f32 %v1183_v13, %v481_v32  ;;  %v532_v34 = vmax.f32 %v490_v30, 0.0 }
  0xe9   : > { %v1246_v35 = vpop.f32.mrf.mxu0 }
  0xea   : > { %v530_v37 = vmax.f32 %v482_v33, 0.0  ;;  %v544_v41 = vpack.c.bf16 %v532_v34, %v531_v38  ;;  %v503_v45 = vadd.f32 %v1246_v35, %v1183_v13 }
  0xeb   : > { %v494_v39 = vpop.f32.mrf.mxu0 }
  0xec   : > { %v543_v40 = vpack.c.bf16 %v530_v37, %v529_v36  ;;  %v495_v43 = vadd.f32 %v1183_v13, %v494_v39  ;;  %v535_v52 = vmax.f32 %v503_v45, 0.0 }
  0xed   : > { %v1247_v42 = vpop.f32.mrf.mxu0 }
  0xee   : > { %v506_v44 = vadd.f32 %v1247_v42, %v1183_v13  ;;  %1260 = vmatprep.mubr.msk.bf16.mxu1 %vm572_vm1, %v543_v40  ;;  %v533_v50 = vmax.f32 %v495_v43, 0.0 }
  0xef   : > { %v497_v46 = vpop.f32.mrf.mxu0  ;;  %1261 = vmatmul.mubr.msk.bf16.gmra.mxu1 %vm572_vm1, %v544_v41 }
  0xf0   : > { %v498_v47 = vadd.f32 %v1183_v13, %v497_v46  ;;  %v536_v48 = vmax.f32 %v506_v44, 0.0 }
  0xf1   : > { %v1250_v49 = vpop.f32.mrf.mxu0 }
  0xf2   : > { %v534_v51 = vmax.f32 %v498_v47, 0.0  ;;  %v546_v55 = vpack.c.bf16 %v536_v48, %v535_v52  ;;  %v519_v59 = vadd.f32 %v1250_v49, %v1183_v13 }
  0xf3   : > { %v510_v53 = vpop.f32.mrf.mxu0 }
  0xf4   : > { %v545_v54 = vpack.c.bf16 %v534_v51, %v533_v50  ;;  %v511_v57 = vadd.f32 %v1183_v13, %v510_v53  ;;  %v539_v1 = vmax.f32 %v519_v59, 0.0 }
  0xf5   : > { %v1251_v56 = vpop.f32.mrf.mxu0 }
  0xf6   : > { %v522_v58 = vadd.f32 %v1251_v56, %v1183_v13  ;;  %1264 = vmatprep.mubr.msk.bf16.mxu1 %vm572_vm1, %v545_v54  ;;  %v537_v63 = vmax.f32 %v511_v57, 0.0 }
  0xf7   : > { %v513_v60 = vpop.f32.mrf.mxu0  ;;  %1265 = vmatmul.mubr.msk.bf16.gmra.mxu1 %vm572_vm1, %v546_v55 }
  0xf8   : > { %v514_v61 = vadd.f32 %v1183_v13, %v513_v60  ;;  %v540_v62 = vmax.f32 %v522_v58, 0.0 }
  0xfa   : > { %v538_v0 = vmax.f32 %v514_v61, 0.0  ;;  %v548_v3 = vpack.c.bf16 %v540_v62, %v539_v1 }
  0xfc   : > { %v547_v2 = vpack.c.bf16 %v538_v0, %v537_v63 }
  0xfe   : > { %1268 = vmatprep.mubr.msk.bf16.mxu1 %vm572_vm1, %v547_v2 }
  0xff   : > { %1269 = vmatmul.mubr.msk.bf16.gmra.mxu1 %vm572_vm1, %v548_v3 }
 0x1a7   : > { %v1258_v5 = vpop.f32.mrf.mxu1 }
 0x1a8   : > { %v640_v6 = vadd.f32 %v1258_v5, %v1604_v4 }
 0x1a9   : > { %v631_v7 = vpop.f32.mrf.mxu1 }
 0x1aa   : > { %v696_v8 = vmul.f32 0.5, %v640_v6  ;;  %v632_v9 = vadd.f32 %v1604_v4, %v631_v7 }
 0x1ab   : > { %v1259_v10 = vpop.f32.mrf.mxu1 }
 0x1ac   : > { %1323 = vtanh.f32 %v696_v8  ;;  %v694_v11 = vmul.f32 0.5, %v632_v9  ;;  %v643_v12 = vadd.f32 %v1259_v10, %v1604_v4 }
 0x1ad   : > { %v634_v13 = vpop.f32.mrf.mxu1 }
 0x1ae   : > { %1325 = vtanh.f32 %v694_v11  ;;  %v697_v14 = vmul.f32 0.5, %v643_v12  ;;  %v635_v15 = vadd.f32 %v1604_v4, %v634_v13 }
 0x1af   : > { %v1262_v16 = vpop.f32.mrf.mxu1 }
 0x1b0   : > { %1327 = vtanh.f32 %v697_v14  ;;  %v695_v17 = vmul.f32 0.5, %v635_v15  ;;  %v656_v18 = vadd.f32 %v1262_v16, %v1604_v4 }
 0x1b1   : > { %v647_v19 = vpop.f32.mrf.mxu1 }
 0x1b2   : > { %1329 = vtanh.f32 %v695_v17  ;;  %v700_v20 = vmul.f32 0.5, %v656_v18  ;;  %v648_v21 = vadd.f32 %v1604_v4, %v647_v19  ;;  %v334_v19 = vld [vmem:[%s1640_s14 + $0x4] sm:$0x3] }
 0x1b3   : > { %v1263_v22 = vpop.f32.mrf.mxu1  ;;  %vm760_vm2 = vnez %v334_v19 }
 0x1b4   : > { %1331 = vtanh.f32 %v700_v20  ;;  %v698_v23 = vmul.f32 0.5, %v648_v21  ;;  %v659_v24 = vadd.f32 %v1263_v22, %v1604_v4 }
 0x1b5   : > { %v650_v25 = vpop.f32.mrf.mxu1 }
 0x1b6   : > { %1333 = vtanh.f32 %v698_v23  ;;  %v701_v26 = vmul.f32 0.5, %v659_v24  ;;  %v651_v27 = vadd.f32 %v1604_v4, %v650_v25  ;;  %v332_v23 = vld [vmem:[%s1640_s14] sm:$0x3] }
 0x1b7   : > { %v1266_v28 = vpop.f32.mrf.mxu1  ;;  %vm758_vm3 = vnez %v332_v23 }
 0x1b8   : > { %1335 = vtanh.f32 %v701_v26  ;;  %v699_v29 = vmul.f32 0.5, %v651_v27  ;;  %v672_v30 = vadd.f32 %v1266_v28, %v1604_v4 }
 0x1b9   : > { %v1324_v31 = vpop.eup %1323  ;;  %v663_v32 = vpop.f32.mrf.mxu1 }
 0x1ba   : > { %1337 = vtanh.f32 %v699_v29  ;;  %v704_v33 = vmul.f32 0.5, %v672_v30  ;;  %v664_v34 = vadd.f32 %v1604_v4, %v663_v32  ;;  %v728_v35 = vmul.f32 0.5, %v1324_v31 }
 0x1bb   : > { %v1326_v36 = vpop.eup %1325  ;;  %v1267_v37 = vpop.f32.mrf.mxu1 }
 0x1bc   : > { %1339 = vtanh.f32 %v704_v33  ;;  %v702_v38 = vmul.f32 0.5, %v664_v34  ;;  %v675_v39 = vadd.f32 %v1267_v37, %v1604_v4  ;;  %v1617_v40 = vadd.f32 0.5, %v728_v35 }
 0x1bd   : > { %v1328_v41 = vpop.eup %1327  ;;  %v666_v42 = vpop.f32.mrf.mxu1  ;;  %v726_v43 = vmul.f32 0.5, %v1326_v36  ;;  %v1481_v36 = vmov 0  }
 0x1be   : > { %1341 = vtanh.f32 %v702_v38  ;;  %v705_v44 = vmul.f32 0.5, %v675_v39  ;;  %v667_v45 = vadd.f32 %v1604_v4, %v666_v42  ;;  %v842_v48 = vmul.f32 1.442695, %v1617_v40  ;;  %v335_v38 = vld [vmem:[%s1640_s14 + $0x6] sm:$0x3] }
 0x1bf   : > { %v1330_v46 = vpop.eup %1329  ;;  %v1270_v47 = vpop.f32.mrf.mxu1  ;;  %v1621_v49 = vadd.f32 0.5, %v726_v43  ;;  %v729_v50 = vmul.f32 0.5, %v1328_v41  ;;  %v1660_v37 = vsel %vm760_vm2, 16843009, %v1481_v36  ;;  %v1666_v43 = vsel %vm758_vm3, 16843009, %v1481_v36 }
 0x1c0   : > { %1343 = vtanh.f32 %v705_v44  ;;  %v703_v51 = vmul.f32 0.5, %v667_v45  ;;  %v688_v52 = vadd.f32 %v1270_v47, %v1604_v4  ;;  %v727_v53 = vmul.f32 0.5, %v1330_v46  ;;  %v333_v45 = vld [vmem:[%s1640_s14 + $0x2] sm:$0x3] }
 0x1c1   : > { %v1332_v54 = vpop.eup %1331  ;;  %v679_v55 = vpop.f32.mrf.mxu1  ;;  %1345 = vpow2.f32 %v842_v48  ;;  %v838_v56 = vmul.f32 1.442695, %v1621_v49  ;;  %v1625_v57 = vadd.f32 0.5, %v729_v50  ;;  %vm761_vm4 = vnez %v335_v38  ;;  %v337_v38 = vld [vmem:[%s1640_s14 + $0xa] sm:$0x3] }
 0x1c2   : > { %1347 = vtanh.f32 %v703_v51  ;;  %v708_v58 = vmul.f32 0.5, %v688_v52  ;;  %v680_v59 = vadd.f32 %v1604_v4, %v679_v55  ;;  %v1628_v60 = vadd.f32 0.5, %v727_v53 }
 0x1c3   : > { %v1334_v61 = vpop.eup %1333  ;;  %v1271_v62 = vpop.f32.mrf.mxu1  ;;  %1349 = vpow2.f32 %v838_v56  ;;  %v844_v63 = vmul.f32 1.442695, %v1625_v57  ;;  %v732_v0 = vmul.f32 0.5, %v1332_v54  ;;  %vm759_vm5 = vnez %v333_v45  ;;  %v342_v45 = vld [vmem:[%s1640_s14 + $0x14] sm:$0x3] }
 0x1c4   : > { %1351 = vtanh.f32 %v708_v58  ;;  %v706_v1 = vmul.f32 0.5, %v680_v59  ;;  %v691_v2 = vadd.f32 %v1271_v62, %v1604_v4  ;;  %v840_v6 = vmul.f32 1.442695, %v1628_v60  ;;  %v338_v62 = vld [vmem:[%s1640_s14 + $0xc] sm:$0x3] }
 0x1c5   : > { %v1336_v3 = vpop.eup %1335  ;;  %v682_v5 = vpop.f32.mrf.mxu1  ;;  %1353 = vpow2.f32 %v844_v63  ;;  %v1634_v7 = vadd.f32 0.5, %v732_v0  ;;  %v730_v8 = vmul.f32 0.5, %v1334_v61  ;;  %v792_v59 = vunpack.c.0.s8 %v1660_v37 }
 0x1c6   : > { %1355 = vtanh.f32 %v706_v1  ;;  %v709_v9 = vmul.f32 0.5, %v691_v2  ;;  %v683_v10 = vadd.f32 %v1604_v4, %v682_v5  ;;  %v733_v11 = vmul.f32 0.5, %v1336_v3 }
 0x1c7   : > { %v1338_v12 = vpop.eup %1337  ;;  %1357 = vpow2.f32 %v840_v6  ;;  %v850_v13 = vmul.f32 1.442695, %v1634_v7  ;;  %v1643_v14 = vadd.f32 0.5, %v730_v8  ;;  %v790_v1 = vunpack.c.0.s8 %v1666_v43 }
 0x1c8   : > { %1359 = vtanh.f32 %v709_v9  ;;  %v707_v15 = vmul.f32 0.5, %v683_v10  ;;  %v1645_v16 = vadd.f32 0.5, %v733_v11  ;;  %v731_v17 = vmul.f32 0.5, %v1338_v12  ;;  %v336_v11 = vld [vmem:[%s1640_s14 + $0x8] sm:$0x3] }
 0x1c9   : > { %v1340_v4 = vpop.eup %1339  ;;  %1361 = vpow2.f32 %v850_v13  ;;  %v846_v18 = vmul.f32 1.442695, %v1643_v14  ;;  %v777_v6 = vsel %vm761_vm4, 16843009, %v1481_v36  ;;  %v775_v8 = vsel %vm759_vm5, 16843009, %v1481_v36 }
 0x1ca   : > { %1363 = vtanh.f32 %v707_v15  ;;  %v852_v20 = vmul.f32 1.442695, %v1645_v16  ;;  %v1650_v21 = vadd.f32 0.5, %v731_v17  ;;  %v736_v24 = vmul.f32 0.5, %v1340_v4 }
 0x1cb   : > { %v1342_v22 = vpop.eup %1341  ;;  %1365 = vpow2.f32 %v846_v18  ;;  %vm764_vm6 = vnez %v338_v62  ;;  %v793_v19 = vunpack.c.0.s8 %v777_v6  ;;  %vm762_vm7 = vnez %v336_v11 }
 0x1cc   : > { %1367 = vpow2.f32 %v852_v20  ;;  %v848_v25 = vmul.f32 1.442695, %v1650_v21  ;;  %v734_v26 = vmul.f32 0.5, %v1342_v22  ;;  %v1654_v28 = vadd.f32 0.5, %v736_v24  ;;  %v339_v20 = vld [vmem:[%s1640_s14 + $0xe] sm:$0x3] }
 0x1cd   : > { %v1344_v27 = vpop.eup %1343  ;;  %vm1699_vm8 = vcmp.ne.s32.totalorder %v792_v59, 0  ;;  %vm765_vm9 = vnez %v339_v20  ;;  %vm1703_vm10 = vcmp.ne.s32.totalorder %v790_v1, 0  ;;  %vm1707_vm11 = vcmp.ne.s32.totalorder %v793_v19, 0 }
 0x1ce   : > { %v1346_v29 = vpop.eup %1345  ;;  %1369 = vpow2.f32 %v848_v25  ;;  %v737_v30 = vmul.f32 0.5, %v1344_v27  ;;  %v1656_v31 = vadd.f32 0.5, %v734_v26  ;;  %v858_v34 = vmul.f32 1.442695, %v1654_v28 }
 0x1cf   : > { %v1348_v32 = vpop.eup %1347  ;;  %v872_v33 = vadd.f32 1.0, %v1346_v29  ;;  %v791_v25 = vunpack.c.0.s8 %v775_v8  ;;  %v1695_v26 = vsel %vm764_vm6, 16843009, %v1481_v36  ;;  %v778_v37 = vsel %vm762_vm7, 16843009, %v1481_v36 }
 0x1d0   : > { %v1350_v35 = vpop.eup %1349  ;;  %v1663_v39 = vadd.f32 0.5, %v737_v30  ;;  %v735_v41 = vmul.f32 0.5, %v1348_v32  ;;  %v854_v48 = vmul.f32 1.442695, %v1656_v31  ;;  %vm763_vm13 = vnez %v337_v38 }
 0x1d1   : > { %v1352_v42 = vpop.eup %1351  ;;  %1371 = vlog2.f32 %v872_v33  ;;  %v870_v44 = vadd.f32 1.0, %v1350_v35  ;;  %vm1713_vm12 = vcmp.ne.s32.totalorder %v791_v25, 0  ;;  %v822_v59 = vsel %vm1703_vm10, %v1621_v49, 0.0  ;;  %v344_v35 = vld [vmem:[%s1640_s14 + $0x18] sm:$0x3] }
 0x1d2   : > { %v1354_v46 = vpop.eup %1353  ;;  %1373 = vpow2.f32 %v858_v34  ;;  %v860_v47 = vmul.f32 1.442695, %v1663_v39  ;;  %v1671_v50 = vadd.f32 0.5, %v735_v41  ;;  %v740_v53 = vmul.f32 0.5, %v1352_v42 }
 0x1d3   : > { %v1356_v51 = vpop.eup %1355  ;;  %1375 = vlog2.f32 %v870_v44  ;;  %v873_v52 = vadd.f32 1.0, %v1354_v46  ;;  %v796_v44 = vunpack.c.0.s8 %v1695_v26  ;;  %vm768_vm14 = vnez %v342_v45 }
 0x1d4   : > { %v1358_v54 = vpop.eup %1357  ;;  %1377 = vpow2.f32 %v860_v47  ;;  %v856_v55 = vmul.f32 1.442695, %v1671_v50  ;;  %v738_v56 = vmul.f32 0.5, %v1356_v51  ;;  %v1676_v63 = vadd.f32 0.5, %v740_v53 }
 0x1d5   : > { %v1360_v58 = vpop.eup %1359  ;;  %1379 = vlog2.f32 %v873_v52  ;;  %v871_v61 = vadd.f32 1.0, %v1358_v54  ;;  %v824_v47 = vsel %vm1699_vm8, %v1617_v40, 0.0  ;;  %v343_v52 = vld [vmem:[%s1640_s14 + $0x16] sm:$0x3]  ;;  %v825_v6 = vsel %vm1707_vm11, %v1625_v57, 0.0 }
 0x1d6   : > { %v1362_v0 = vpop.eup %1361  ;;  %1381 = vpow2.f32 %v854_v48  ;;  %v1679_v2 = vadd.f32 0.5, %v738_v56  ;;  %v741_v3 = vmul.f32 0.5, %v1360_v58  ;;  %v866_v4 = vmul.f32 1.442695, %v1676_v63 }
 0x1d7   : > { %v1364_v5 = vpop.eup %1363  ;;  %1383 = vlog2.f32 %v871_v61  ;;  %v876_v9 = vadd.f32 1.0, %v1362_v0  ;;  %v781_v48 = vsel %vm765_vm9, 16843009, %v1481_v36  ;;  %v794_v56 = vunpack.c.0.s8 %v778_v37  ;;  %v340_v61 = vld [vmem:[%s1640_s14 + $0x10] sm:$0x3] }
 0x1d8   : > { %v1366_v10 = vpop.eup %1365  ;;  %1385 = vpow2.f32 %v856_v55  ;;  %v862_v12 = vmul.f32 1.442695, %v1679_v2  ;;  %v739_v13 = vmul.f32 0.5, %v1364_v5  ;;  %v1688_v18 = vadd.f32 0.5, %v741_v3 }
 0x1d9   : > { %v1368_v15 = vpop.eup %1367  ;;  %1387 = vlog2.f32 %v876_v9  ;;  %v874_v17 = vadd.f32 1.0, %v1366_v10  ;;  %v797_v3 = vunpack.c.0.s8 %v781_v48  ;;  %vm769_vm15 = vnez %v343_v52  ;;  %v341_v9 = vld [vmem:[%s1640_s14 + $0x12] sm:$0x3] }
 0x1da   : > { %v877_v22 = vadd.f32 1.0, %v1368_v15  ;;  %1389 = vpow2.f32 %v862_v12  ;;  %v1691_v23 = vadd.f32 0.5, %v739_v13  ;;  %v868_v30 = vmul.f32 1.442695, %v1688_v18 }
 0x1db   : > { %v1370_v24 = vpop.eup %1369  ;;  %1391 = vlog2.f32 %v874_v17  ;;  %v779_v8 = vsel %vm763_vm13, 16843009, %v1481_v36  ;;  %v784_v13 = vsel %vm768_vm14, 16843009, %v1481_v36  ;;  %vm766_vm0 = vnez %v340_v61  ;;  %v345_v61 = vld [vmem:[%s1640_s14 + $0x1a] sm:$0x3] }
 0x1dc   : > { %1393 = vlog2.f32 %v877_v22  ;;  %v875_v27 = vadd.f32 1.0, %v1370_v24  ;;  %v864_v29 = vmul.f32 1.442695, %v1691_v23  ;;  %v823_v17 = vsel %vm1713_vm12, %v1628_v60, 0.0 }
 0x1dd   : > { %1395 = vpow2.f32 %v866_v4  ;;  %v785_v57 = vsel %vm769_vm15, 16843009, %v1481_v36  ;;  %vm1740_vm1 = vcmp.ne.s32.totalorder %v796_v44, 0  ;;  %vm767_vm2 = vnez %v341_v9 }
 0x1de   : > { %v1372_v33 = vpop.eup %1371  ;;  %1397 = vlog2.f32 %v875_v27  ;;  %vm1744_vm3 = vcmp.ne.s32.totalorder %v797_v3, 0  ;;  %v795_v60 = vunpack.c.0.s8 %v779_v8  ;;  %vm1748_vm4 = vcmp.ne.s32.totalorder %v794_v56, 0 }
 0x1df   : > { %v1374_v41 = vpop.eup %1373  ;;  %v891_v42 = vmul.f32 0.6931472, %v1372_v33  ;;  %1399 = vpow2.f32 %v864_v29  ;;  %v800_v32 = vunpack.c.0.s8 %v784_v13  ;;  %v801_v33 = vunpack.c.0.s8 %v785_v57 }
 0x1e0   : > { %v1376_v46 = vpop.eup %1375  ;;  %v880_v51 = vadd.f32 1.0, %v1374_v41  ;;  %1401 = vpow2.f32 %v868_v30  ;;  %v782_v34 = vsel %vm766_vm0, 16843009, %v1481_v36  ;;  %v828_v38 = vsel %vm1740_vm1, %v1634_v7, 0.0 }
 0x1e1   : > { %v1378_v53 = vpop.eup %1377  ;;  %v920_v54 = vsub.f32 %v824_v47, %v891_v42  ;;  %v887_v55 = vmul.f32 0.6931472, %v1376_v46  ;;  %v783_v42 = vsel %vm767_vm2, 16843009, %v1481_v36  ;;  %v829_v45 = vsel %vm1744_vm3, %v1645_v16, 0.0 }
 0x1e2   : > { %v1380_v58 = vpop.eup %1379  ;;  %1403 = vlog2.f32 %v880_v51  ;;  %v881_v40 = vadd.f32 1.0, %v1378_v53  ;;  %vm1763_vm5 = vcmp.ne.s32.totalorder %v795_v60, 0  ;;  %vm770_vm6 = vnez %v344_v35  ;;  %v346_v16 = vld [vmem:[%s1640_s14 + $0x1c] sm:$0x3] }
 0x1e3   : > { %v1382_v62 = vpop.eup %1381  ;;  %938 = vadd.xlane.f32.xlu1 %v920_v54  ;;  %v918_v0 = vsub.f32 %v822_v59, %v887_v55  ;;  %v893_v1 = vmul.f32 0.6931472, %v1380_v58  ;;  %vm1767_vm7 = vcmp.ne.s32.totalorder %v800_v32, 0  ;;  %v798_v55 = vunpack.c.0.s8 %v782_v34 }
 0x1e4   : > { %v1384_v5 = vpop.eup %1383  ;;  %1405 = vlog2.f32 %v881_v40  ;;  %v878_v49 = vadd.f32 1.0, %v1382_v62  ;;  %v826_v58 = vsel %vm1748_vm4, %v1643_v14, 0.0  ;;  %vm1775_vm8 = vcmp.ne.s32.totalorder %v801_v33, 0 }
 0x1e5   : > { %v1386_v10 = vpop.eup %1385  ;;  %934 = vadd.xlane.f32.xlu0 %v918_v0  ;;  %v921_v11 = vsub.f32 %v825_v6, %v893_v1  ;;  %v889_v12 = vmul.f32 0.6931472, %v1384_v5  ;;  %v799_v40 = vunpack.c.0.s8 %v783_v42  ;;  %v827_v3 = vsel %vm1763_vm5, %v1650_v21, 0.0 }
 0x1e6   : > { %v1388_v15 = vpop.eup %1387  ;;  %1407 = vlog2.f32 %v878_v49  ;;  %v879_v4 = vadd.f32 1.0, %v1386_v10  ;;  %v786_v5 = vsel %vm770_vm6, 16843009, %v1481_v36  ;;  %vm772_vm9 = vnez %v346_v16 }
 0x1e7   : > { %v1390_v19 = vpop.eup %1389  ;;  %940 = vadd.xlane.f32.xlu1 %v921_v11  ;;  %v919_v20 = vsub.f32 %v823_v17, %v889_v12  ;;  %v899_v24 = vmul.f32 0.6931472, %v1388_v15  ;;  %vm771_vm10 = vnez %v345_v61  ;;  %v832_v49 = vsel %vm1767_vm7, %v1654_v28, 0.0  ;;  %v347_v11 = vld [vmem:[%s1640_s14 + $0x1e] sm:$0x3] }
 0x1e8   : > { %v1392_v25 = vpop.eup %1391  ;;  %1409 = vlog2.f32 %v879_v4  ;;  %v882_v27 = vadd.f32 1.0, %v1390_v19  ;;  %v802_v10 = vunpack.c.0.s8 %v786_v5  ;;  %v833_v13 = vsel %vm1775_vm8, %v1663_v39, 0.0 }
 0x1e9   : > { %v1394_v29 = vpop.eup %1393  ;;  %936 = vadd.xlane.f32.xlu0 %v919_v20  ;;  %v924_v44 = vsub.f32 %v828_v38, %v899_v24  ;;  %v895_v46 = vmul.f32 0.6931472, %v1392_v25  ;;  %vm814_vm11 = vcmp.ne.s32.totalorder %v798_v55, 0  ;;  %v788_v15 = vsel %vm772_vm9, 16843009, %v1481_v36 }
 0x1ea   : > { %v1396_v37 = vpop.eup %1395  ;;  %v901_v41 = vmul.f32 0.6931472, %v1394_v29  ;;  %1411 = vlog2.f32 %v882_v27  ;;  %vm815_vm12 = vcmp.ne.s32.totalorder %v799_v40, 0  ;;  %v787_v4 = vsel %vm771_vm10, 16843009, %v1481_v36 }
 0x1eb   : > { %v1398_v43 = vpop.eup %1397  ;;  %v884_v47 = vadd.f32 1.0, %v1396_v37  ;;  %v922_v1 = vsub.f32 %v826_v58, %v895_v46  ;;  %vm773_vm13 = vnez %v347_v11  ;;  %v830_v28 = vsel %vm814_vm11, %v1656_v31, 0.0 }
 0x1ec   : > { %v1400_v48 = vpop.eup %1399  ;;  %v925_v51 = vsub.f32 %v829_v45, %v901_v41  ;;  %v897_v7 = vmul.f32 0.6931472, %v1398_v43  ;;  %vm818_vm14 = vcmp.ne.s32.totalorder %v802_v10, 0  ;;  %v831_v39 = vsel %vm815_vm12, %v1671_v50, 0.0 }
 0x1ed   : > { %v1402_v53 = vpop.eup %1401  ;;  %946 = vadd.xlane.f32.xlu0 %v924_v44  ;;  %v883_v56 = vadd.f32 1.0, %v1400_v48  ;;  %1413 = vlog2.f32 %v884_v47  ;;  %v803_v25 = vunpack.c.0.s8 %v787_v4  ;;  %v804_v26 = vunpack.c.0.s8 %v788_v15 }
 0x1ee   : > { %948 = vadd.xlane.f32.xlu1 %v925_v51  ;;  %v885_v62 = vadd.f32 1.0, %v1402_v53  ;;  %v923_v6 = vsub.f32 %v827_v3, %v897_v7  ;;  %v789_v29 = vsel %vm773_vm13, 16843009, %v1481_v36  ;;  %v834_v30 = vsel %vm818_vm14, %v1679_v2, 0.0 }
 0x1ef   : > { %v1404_v0 = vpop.eup %1403  ;;  %1415 = vlog2.f32 %v883_v56  ;;  %vm819_vm15 = vcmp.ne.s32.totalorder %v803_v25, 0  ;;  %vm820_vm0 = vcmp.ne.s32.totalorder %v804_v26, 0  ;;  %v805_v34 = vunpack.c.0.s8 %v789_v29 }
 0x1f0   : > { %v907_v14 = vmul.f32 0.6931472, %v1404_v0  ;;  %1417 = vlog2.f32 %v885_v62  ;;  %v835_v38 = vsel %vm819_vm15, %v1691_v23, 0.0  ;;  %v836_v41 = vsel %vm820_vm0, %v1676_v63, 0.0 }
 0x1f1   : > { %v1406_v8 = vpop.eup %1405  ;;  %942 = vadd.xlane.f32.xlu0 %v922_v1  ;;  %vm821_vm1 = vcmp.ne.s32.totalorder %v805_v34, 0  ;;  %v982_v45 = vlaneseq  ;;  %vm993_vm2 = vcmask 130112   ;;  %vm1000_vm3 = vcmask 195712  }
 0x1f2   : > { %944 = vadd.xlane.f32.xlu1 %v923_v6  ;;  %v909_v9 = vmul.f32 0.6931472, %v1406_v8  ;;  %v928_v12 = vsub.f32 %v832_v49, %v907_v14  ;;  %v837_v2 = vsel %vm821_vm1, %v1688_v18, 0.0  ;;  %vm1007_vm4 = vcmask 261312  }
 0x1f3   : > { %v1408_v21 = vpop.eup %1407  ;;  %v1801_v46 = vand.u32 127, %v982_v45  ;;  %v1804_v48 = vshrl.u32 %v982_v45, 7  ;;  %vm1014_vm5 = vcmask 326912   ;;  %vm1021_vm6 = vcmask 392512  }
 0x1f4   : > { %v929_v17 = vsub.f32 %v833_v13, %v909_v9  ;;  %v903_v57 = vmul.f32 0.6931472, %v1408_v21  ;;  %vm1028_vm7 = vcmask 458112   ;;  %vm1035_vm8 = vcmask 523712  }
 0x1f5   : > { %v1410_v19 = vpop.eup %1409  ;;  %954 = vadd.xlane.f32.xlu0 %v928_v12  ;;  %v988_v47 = vadd.s32 4294967288, %v1801_v46  ;;  %v995_v63 = vadd.s32 4294967280, %v1801_v46  ;;  %v986_v7 = vsub.s32 %v1801_v46, %v1804_v48  ;;  %v1002_v18 = vadd.s32 4294967272, %v1801_v46 }
 0x1f6   : > { %956 = vadd.xlane.f32.xlu1 %v929_v17  ;;  %v905_v20 = vmul.f32 0.6931472, %v1410_v19  ;;  %v926_v24 = vsub.f32 %v830_v28, %v903_v57  ;;  %v1009_v16 = vadd.s32 4294967264, %v1801_v46  ;;  %v1016_v59 = vadd.s32 4294967256, %v1801_v46 }
 0x1f7   : > { %v1412_v22 = vpop.eup %1411  ;;  %v991_v52 = vsub.s32 %v988_v47, %v1804_v48  ;;  %v998_v54 = vsub.s32 %v995_v63, %v1804_v48  ;;  %v1005_v40 = vsub.s32 %v1002_v18, %v1804_v48  ;;  %v1023_v1 = vadd.s32 4294967248, %v1801_v46 }
 0x1f8   : > { %v927_v60 = vsub.f32 %v831_v39, %v905_v20  ;;  %v911_v27 = vmul.f32 0.6931472, %v1412_v22  ;;  %v1012_v5 = vsub.s32 %v1009_v16, %v1804_v48  ;;  %v1019_v6 = vsub.s32 %v1016_v59, %v1804_v48 }
 0x1f9   : > { %950 = vadd.xlane.f32.xlu0 %v926_v24  ;;  %v1030_v49 = vadd.s32 4294967240, %v1801_v46  ;;  %v1026_v10 = vsub.s32 %v1023_v1, %v1804_v48  ;;  %v1037_v12 = vadd.s32 4294967232, %v1801_v46  ;;  %v1044_v17 = vadd.s32 4294967224, %v1801_v46 }
 0x1fa   : > { %v1414_v32 = vpop.eup %1413  ;;  %952 = vadd.xlane.f32.xlu1 %v927_v60  ;;  %v930_v33 = vsub.f32 %v834_v30, %v911_v27  ;;  %v1051_v4 = vadd.s32 4294967216, %v1801_v46  ;;  %v1058_v22 = vadd.s32 4294967208, %v1801_v46  ;;  %v1065_v60 = vadd.s32 4294967200, %v1801_v46 }
 0x1fb   : > { %v915_v31 = vmul.f32 0.6931472, %v1414_v32  ;;  %v1033_v19 = vsub.s32 %v1030_v49, %v1804_v48  ;;  %v1040_v25 = vsub.s32 %v1037_v12, %v1804_v48  ;;  %v1047_v26 = vsub.s32 %v1044_v17, %v1804_v48 }
 0x1fc   : > { %v1416_v35 = vpop.eup %1415  ;;  %v1054_v29 = vsub.s32 %v1051_v4, %v1804_v48  ;;  %v1061_v32 = vsub.s32 %v1058_v22, %v1804_v48  ;;  %vm1042_vm9 = vcmask 589312   ;;  %vm1049_vm10 = vcmask 654912  }
 0x1fd   : > { %v1418_v37 = vpop.eup %1417  ;;  %958 = vadd.xlane.f32.xlu0 %v930_v33  ;;  %v913_v50 = vmul.f32 0.6931472, %v1416_v35  ;;  %v932_v36 = vsub.f32 %v836_v41, %v915_v31  ;;  %vm1056_vm11 = vcmask 720512   ;;  %v1072_v35 = vadd.s32 4294967192, %v1801_v46 }
 0x1fe   : > { %v917_v43 = vmul.f32 0.6931472, %v1418_v37  ;;  %v1079_v41 = vadd.s32 4294967184, %v1801_v46  ;;  %vm1063_vm12 = vcmask 786112   ;;  %vm1070_vm13 = vcmask 851712  }
 0x1ff   : > { %v931_v42 = vsub.f32 %v835_v38, %v913_v50  ;;  %v1068_v38 = vsub.s32 %v1065_v60, %v1804_v48  ;;  %v1075_v47 = vsub.s32 %v1072_v35, %v1804_v48  ;;  %vm1077_vm14 = vcmask 917312  }
 0x200   : > { %v933_v44 = vsub.f32 %v837_v2, %v917_v43  ;;  %v1082_v63 = vsub.s32 %v1079_v41, %v1804_v48  ;;  %vm1084_vm15 = vcmask 982912   ;;  %vm1091_vm0 = vcmask 1048512  }
 0x201   : > { %960 = vadd.xlane.f32.xlu1 %v931_v42  ;;  %962 = vadd.xlane.f32.xlu0 %v932_v36 }
 0x205   : > { %964 = vadd.xlane.f32.xlu1 %v933_v44 }
 0x26c   : > { %v939_v23 = vpop.xlane.xlu1 %938 }
 0x26d   : > { %v999_v0 = vrot.slane %v939_v23, %v998_v54  ;;  %v1086_v23 = vadd.s32 4294967176, %v1801_v46 }
 0x26e   : > { %v935_v51 = vpop.xlane.xlu0 %934 }
 0x26f   : > { %v987_v58 = vrot.slane %v935_v51, %v986_v7  ;;  %v1089_v54 = vsub.s32 %v1086_v23, %v1804_v48 }
 0x270   : > { %v941_v55 = vpop.xlane.xlu1 %940 }
 0x271   : > { %v1006_v8 = vrot.slane %v941_v55, %v1005_v40 }
 0x272   : > { %v937_v53 = vpop.xlane.xlu0 %936 }
 0x273   : > { %v992_v56 = vrot.slane %v937_v53, %v991_v52 }
 0x275   : > { %v994_v61 = vsel %vm993_vm2, %v992_v56, %v987_v58 }
 0x276   : > { %v947_v62 = vpop.xlane.xlu0 %946  ;;  %v1001_v14 = vsel %vm1000_vm3, %v999_v0, %v994_v61 }
 0x277   : > { %v949_v3 = vpop.xlane.xlu1 %948  ;;  %v1008_v13 = vsel %vm1007_vm4, %v1006_v8, %v1001_v14  ;;  %v1027_v24 = vrot.slane %v947_v62, %v1026_v10 }
 0x278   : > { %v1034_v30 = vrot.slane %v949_v3, %v1033_v19 }
 0x27a   : > { %v943_v9 = vpop.xlane.xlu0 %942 }
 0x27b   : > { %v1013_v11 = vrot.slane %v943_v9, %v1012_v5  ;;  %v945_v21 = vpop.xlane.xlu1 %944 }
 0x27c   : > { %v1020_v15 = vrot.slane %v945_v21, %v1019_v6 }
 0x27d   : > { %v1015_v57 = vsel %vm1014_vm5, %v1013_v11, %v1008_v13 }
 0x27e   : > { %v1022_v28 = vsel %vm1021_vm6, %v1020_v15, %v1015_v57  ;;  %v955_v20 = vpop.xlane.xlu0 %954 }
 0x27f   : > { %v957_v39 = vpop.xlane.xlu1 %956  ;;  %v1029_v27 = vsel %vm1028_vm7, %v1027_v24, %v1022_v28  ;;  %v1055_v42 = vrot.slane %v955_v20, %v1054_v29 }
 0x280   : > { %v1036_v37 = vsel %vm1035_vm8, %v1034_v30, %v1029_v27  ;;  %v1062_v44 = vrot.slane %v957_v39, %v1061_v32 }
 0x282   : > { %v951_v33 = vpop.xlane.xlu0 %950 }
 0x283   : > { %v1041_v31 = vrot.slane %v951_v33, %v1040_v25  ;;  %v953_v34 = vpop.xlane.xlu1 %952 }
 0x284   : > { %v1048_v50 = vrot.slane %v953_v34, %v1047_v26 }
 0x285   : > { %v1043_v36 = vsel %vm1042_vm9, %v1041_v31, %v1036_v37 }
 0x286   : > { %v1050_v43 = vsel %vm1049_vm10, %v1048_v50, %v1043_v36  ;;  %v959_v2 = vpop.xlane.xlu0 %958 }
 0x287   : > { %v1057_v45 = vsel %vm1056_vm11, %v1055_v42, %v1050_v43  ;;  %v1069_v51 = vrot.slane %v959_v2, %v1068_v38 }
 0x288   : > { %v1064_v52 = vsel %vm1063_vm12, %v1062_v44, %v1057_v45 }
 0x289   : > { %v1071_v55 = vsel %vm1070_vm13, %v1069_v51, %v1064_v52 }
 0x28a   : > { %v961_v7 = vpop.xlane.xlu1 %960  ;;  %v963_v18 = vpop.xlane.xlu0 %962 }
 0x28b   : > { %v1076_v53 = vrot.slane %v961_v7, %v1075_v47  ;;  %v1083_v56 = vrot.slane %v963_v18, %v1082_v63 }
 0x28d   : > { %v1078_v16 = vsel %vm1077_vm14, %v1076_v53, %v1071_v55 }
 0x28e   : > { %v965_v46 = vpop.xlane.xlu1 %964  ;;  %v1085_v59 = vsel %vm1084_vm15, %v1083_v56, %v1078_v16 }
 0x28f   : > { %v1090_v58 = vrot.slane %v965_v46, %v1089_v54 }
 0x291   : > { %v1092_v40 = vsel %vm1091_vm0, %v1090_v58, %v1085_v59 }
 0x292   : > { %1094 = vst [vmem:[%s284_s15] sm:$0x1] %v1092_v40 }
 0x293   : > { %1432 = shalt.err (!%p1429_p3)
}
 0x294   : > { %s1433_s11 = scalar_lea.hbm %s1842_s19, 16  ;;  %s1437_s13 = scalar_lea.hbm %s1883_s6, 32 }
 0x295   : > { %p1434_p4 = scmp.ne.s32.totalorder %s1842_s19, %s1433_s11  ;;  %p1438_p9 = scmp.lt.s32.totalorder %s1842_s19, %s1883_s6 }
 0x296   : > { %p1439_p10 = scmp.lt.s32.totalorder %s1437_s13, %s1433_s11 }
 0x297   : > { %p1435_p7 = pnand %p1434_p4, %p1553_p5 }
 0x298   : > { %p1440_p11 = por %p1439_p10, %p1438_p9 }
 0x299   : > { %p1436_p8 = pneg %p1435_p7 }
 0x29b   : > { %p1441_p12 = pnand %p1440_p11, %p1436_p8 }
 0x29d   : > { %1444 = shalt.err (!%p1441_p12)
}
 0x29e   : > { %1272 = dma.vmem_to_hbm [thread:$0]  (%p1553_p5), %s1109_s16, 16, %s1842_s19, %s1096_s20  }
 0x29f PF: > { %p1278_p13 = scmp.ge.s32.totalorder %s1479_s24, 2  ;;  %s1120_s15 = sand.u32 1, %s1467_s21  }
 0x2a0   : > { %s1121_s17 = scalar_lea.sflag [#allocation3], %s1120_s15 }
 0x2a1   : > { %p1275_p0 = pnand %p1278_p13, %p1557_p6 }
 0x2a3   : > { %p1276_p1 = pneg %p1275_p0 }
 0x2a5   : > { %1462 = dma.done.wait (%p1276_p1), %s1121_s17, 16  }
 0x2a6   : > { %1464 = vsyncadd (%p1276_p1), %s1121_s17, 4294967280  ;;  %p16_p2 = scmp.ge.s32.totalorder %s1541_s27, 4   ;;  %s1906_s21 = smov %s1471_s22 }
 0x2a7   : > { %s1907_s22 = smov %s1475_s23  ;;  %s1908_s23 = smov %s1551_s30 }
 0x2a8   : > { %s1909_s24 = smov %s1541_s27  ;;  %18 = sbr.rel (!%p16_p2) target bundleno = 3 (0x3), region = 82 }
 0x2ad   :  { %1125 = vsyncpa [#allocation3], 1 }
 0x2ae   :  { %1127 = vsyncpa [#allocation3 + $0x1], 1 }

</bundles_post_ra>
